<compile_context>
chip_gen: v7x
topology: tpu7x:2x2x1
jax: 0.10.0
libtpu: 0.0.40
codegen_flags: <defaults>
</compile_context>

<pallas_src>
from functools import partial

import jax
import jax.numpy as jnp
from jax.experimental import pallas as pl
from jax.experimental.pallas import tpu as pltpu

LANE = 128          # lane width / padded feature dim
SUB = 8             # sublane alignment for batch
H1, H2 = 128, 64    # hidden layer widths of the original module
PACKED_ROWS = 3 * LANE + SUB   # 392 rows (multiple of 8)
MAX_TILE_M = 512    # batch tile for large-batch (replay / vectorized-env) evaluation


def dqn_mlp_kernel(x_ref, p_ref, o_ref):
    # x_ref: [BM, 128], p_ref: [392, 128], o_ref: [BM, 128] — all lane-dense.
    x = x_ref[...]

    w1 = p_ref[0:LANE, :]                 # [128, 128]
    w2 = p_ref[LANE:2 * LANE, :]          # [128, 128]
    w3 = p_ref[2 * LANE:3 * LANE, :]      # [128, 128]
    bias = p_ref[3 * LANE:3 * LANE + SUB, :]   # one aligned [8, 128] load
    b1 = bias[0:1, :]
    b2 = bias[1:2, :]
    b3 = bias[2:3, :]

    h1 = jnp.maximum(jnp.dot(x, w1, preferred_element_type=jnp.float32) + b1, 0.0)
    h2 = jnp.maximum(jnp.dot(h1, w2, preferred_element_type=jnp.float32) + b2, 0.0)
    out = jnp.dot(h2, w3, preferred_element_type=jnp.float32) + b3
    o_ref[...] = out.astype(o_ref.dtype)  # full [BM, 128] unmasked lane-dense store


def pack_params(params, input_dim, num_actions):
    """Pack the 6 (already-transposed) tensors into one [392,128] zero-padded buffer.

    Call this ONCE per weight update (or wrap in jax.jit in a training step); do NOT
    call it per forward — the packed buffer is reused unchanged across acting steps.
    """
    packed = jnp.zeros((PACKED_ROWS, LANE), jnp.float32)
    packed = packed.at[0:input_dim, :H1].set(params["w1"])                       # w1: [in,128]
    packed = packed.at[LANE:LANE + H1, :H2].set(params["w2"])                    # w2: [128,64]
    packed = packed.at[2 * LANE:2 * LANE + H2, :num_actions].set(params["w3"])   # w3: [64,A]
    packed = packed.at[3 * LANE + 0, :H1].set(params["b1"][0])
    packed = packed.at[3 * LANE + 1, :H2].set(params["b2"][0])
    packed = packed.at[3 * LANE + 2, :num_actions].set(params["b3"][0])
    return packed


@partial(jax.jit, static_argnames=("num_actions",))
def dqn_task1_forward(x, packed, num_actions):
    """x: [B, input_dim] float32. packed: [392,128] pre-packed params (see pack_params)."""
    B, input_dim = x.shape
    assert num_actions <= LANE and input_dim <= LANE

    # Pad batch to a sublane-aligned tile; choose a batch tile and grid over it for
    # large-batch evaluation (weights stay VMEM-resident across grid steps).
    B_pad = max(SUB, ((B + SUB - 1) // SUB) * SUB)
    if B_pad > MAX_TILE_M:
        BM = MAX_TILE_M
        B_pad = ((B_pad + BM - 1) // BM) * BM
    else:
        BM = B_pad
    n_tiles = B_pad // BM

    # Single fused pad op (zero padding keeps numerics exact: padded x lanes are 0 and
    # the corresponding w1 rows are 0).
    x_pad = jnp.pad(x, ((0, B_pad - B), (0, LANE - input_dim)))

    cost = pl.CostEstimate(
        flops=2 * B_pad * LANE * LANE * 3,
        transcendentals=0,
        bytes_accessed=(2 * B_pad * LANE + PACKED_ROWS * LANE) * 4,
    )

    out_pad = pl.pallas_call(
        dqn_mlp_kernel,
        out_shape=jax.ShapeDtypeStruct((B_pad, LANE), jnp.float32),
        grid_spec=pltpu.PrefetchScalarGridSpec(
            num_scalar_prefetch=0,
            grid=(n_tiles,),
            in_specs=[
                pl.BlockSpec((BM, LANE), lambda i: (i, 0)),
                pl.BlockSpec((PACKED_ROWS, LANE), lambda i: (0, 0)),  # weights resident
            ],
            out_specs=pl.BlockSpec((BM, LANE), lambda i: (i, 0)),
        ),
        compiler_params=pltpu.CompilerParams(dimension_semantics=("parallel",)),
        cost_estimate=cost,
    )(x_pad, packed)

    # Slice fuses into this jit — padded lanes are exactly 0, padded rows are dropped.
    return out_pad[:B, :num_actions]


def init_params(key, input_dim, num_actions):
    """Deterministic init mimicking PyTorch nn.Linear default (uniform +/- 1/sqrt(fan_in)).
    Weights stored transposed: [in_features, out_features]."""
    def linear(key, fan_in, fan_out):
        kw, kb = jax.random.split(key)
        bound = 1.0 / jnp.sqrt(float(fan_in))
        w = jax.random.uniform(kw, (fan_in, fan_out), jnp.float32, -bound, bound)
        b = jax.random.uniform(kb, (1, fan_out), jnp.float32, -bound, bound)
        return w, b

    k1, k2, k3 = jax.random.split(key, 3)
    w1, b1 = linear(k1, input_dim, H1)
    w2, b2 = linear(k2, H1, H2)
    w3, b3 = linear(k3, H2, num_actions)
    return {"w1": w1, "b1": b1, "w2": w2, "b2": b2, "w3": w3, "b3": b3}


def reference_forward(x, p):
    h1 = jnp.maximum(x @ p["w1"] + p["b1"], 0.0)
    h2 = jnp.maximum(h1 @ p["w2"] + p["b2"], 0.0)
    return h2 @ p["w3"] + p["b3"]


if __name__ == "__main__":
    # CartPole-like shapes: state dim 4, 2 actions.
    input_dim, num_actions = 4, 2

    key = jax.random.PRNGKey(0)
    kx, kp, kx2 = jax.random.split(key, 3)
    params = init_params(kp, input_dim, num_actions)

    # Pack params ONCE (hoisted out of the forward path).
    packed = pack_params(params, input_dim, num_actions)

    # Small acting-style batch.
    x_small = jax.random.normal(kx, (2, input_dim), dtype=jnp.float32)
    out_small = jax.block_until_ready(dqn_task1_forward(x_small, packed, num_actions))
    ref_small = reference_forward(x_small, params)
    assert out_small.shape == (2, num_actions)
    assert jnp.allclose(out_small, ref_small, atol=1e-5, rtol=1e-5)

    # Larger replay-style batch exercising the batch grid (n_tiles > 1, weights resident).
    x_big = jax.random.normal(kx2, (1000, input_dim), dtype=jnp.float32)
    out_big = jax.block_until_ready(dqn_task1_forward(x_big, packed, num_actions))
    ref_big = reference_forward(x_big, params)
    assert out_big.shape == (1000, num_actions)
    assert jnp.allclose(out_big, ref_big, atol=1e-4, rtol=1e-4)

    print("KERNEL_OK")
</pallas_src>

<mosaic_0001>
module attributes {stable_mosaic.version = 11 : i64} {
  func.func @dqn_mlp_kernel(%arg0: i32, %arg1: memref<8x128xf32, #tpu.memory_space<vmem>>, %arg2: memref<392x128xf32, #tpu.memory_space<vmem>>, %arg3: memref<8x128xf32, #tpu.memory_space<vmem>>) attributes {dimension_semantics = [#tpu.dimension_semantics<parallel>], iteration_bounds = array<i64: 1>, scalar_prefetch = 0 : i64, scratch_operands = 0 : i64, tpu.core_type = #tpu.core_type<tc>, window_params = [{transform_indices = @transform_0, window_bounds = array<i64: 8, 128>}, {pipeline_mode = #tpu.pipeline_mode<synchronous>, transform_indices = @transform_1, window_bounds = array<i64: 392, 128>}, {transform_indices = @transform_2, window_bounds = array<i64: 8, 128>}]} {
    %c0 = arith.constant 0 : index
    %c0_0 = arith.constant 0 : index
    %0 = vector.load %arg1[%c0, %c0_0] : memref<8x128xf32, #tpu.memory_space<vmem>>, vector<8x128xf32>
    %c0_1 = arith.constant 0 : index
    %c0_2 = arith.constant 0 : index
    %1 = vector.load %arg2[%c0_1, %c0_2] : memref<392x128xf32, #tpu.memory_space<vmem>>, vector<128x128xf32>
    %c128 = arith.constant 128 : index
    %c0_3 = arith.constant 0 : index
    %2 = vector.load %arg2[%c128, %c0_3] : memref<392x128xf32, #tpu.memory_space<vmem>>, vector<128x128xf32>
    %c256 = arith.constant 256 : index
    %c0_4 = arith.constant 0 : index
    %3 = vector.load %arg2[%c256, %c0_4] : memref<392x128xf32, #tpu.memory_space<vmem>>, vector<128x128xf32>
    %c384 = arith.constant 384 : index
    %c0_5 = arith.constant 0 : index
    %4 = vector.load %arg2[%c384, %c0_5] : memref<392x128xf32, #tpu.memory_space<vmem>>, vector<8x128xf32>
    %5 = vector.extract_strided_slice %4 {offsets = [0, 0], sizes = [1, 128], strides = [1, 1]} : vector<8x128xf32> to vector<1x128xf32>
    %6 = vector.extract_strided_slice %4 {offsets = [1, 0], sizes = [1, 128], strides = [1, 1]} : vector<8x128xf32> to vector<1x128xf32>
    %7 = vector.extract_strided_slice %4 {offsets = [2, 0], sizes = [1, 128], strides = [1, 1]} : vector<8x128xf32> to vector<1x128xf32>
    %cst = arith.constant dense<0.000000e+00> : vector<8x128xf32>
    %8 = tpu.matmul %0, %1, %cst {dimension_numbers = #tpu.dot_dimension_numbers<[1], [0], [0], [1], [0, 0, 1, 1], [], []>} : vector<8x128xf32>, vector<128x128xf32>, vector<8x128xf32> -> vector<8x128xf32>
    %9 = vector.broadcast %5 : vector<1x128xf32> to vector<8x128xf32>
    %10 = arith.addf %8, %9 : vector<8x128xf32>
    %cst_6 = arith.constant 0.000000e+00 : f32
    %11 = vector.broadcast %cst_6 : f32 to vector<8x128xf32>
    %12 = arith.maximumf %10, %11 : vector<8x128xf32>
    %cst_7 = arith.constant dense<0.000000e+00> : vector<8x128xf32>
    %13 = tpu.matmul %12, %2, %cst_7 {dimension_numbers = #tpu.dot_dimension_numbers<[1], [0], [0], [1], [0, 0, 1, 1], [], []>} : vector<8x128xf32>, vector<128x128xf32>, vector<8x128xf32> -> vector<8x128xf32>
    %14 = vector.broadcast %6 : vector<1x128xf32> to vector<8x128xf32>
    %15 = arith.addf %13, %14 : vector<8x128xf32>
    %cst_8 = arith.constant 0.000000e+00 : f32
    %16 = vector.broadcast %cst_8 : f32 to vector<8x128xf32>
    %17 = arith.maximumf %15, %16 : vector<8x128xf32>
    %cst_9 = arith.constant dense<0.000000e+00> : vector<8x128xf32>
    %18 = tpu.matmul %17, %3, %cst_9 {dimension_numbers = #tpu.dot_dimension_numbers<[1], [0], [0], [1], [0, 0, 1, 1], [], []>} : vector<8x128xf32>, vector<128x128xf32>, vector<8x128xf32> -> vector<8x128xf32>
    %19 = vector.broadcast %7 : vector<1x128xf32> to vector<8x128xf32>
    %20 = arith.addf %18, %19 : vector<8x128xf32>
    %c0_10 = arith.constant 0 : index
    %c0_11 = arith.constant 0 : index
    %21 = vector.load %arg3[%c0_10, %c0_11] : memref<8x128xf32, #tpu.memory_space<vmem>>, vector<8x128xf32>
    tpu.vector_store %arg3[%c0_10, %c0_11], %20 {strides = array<i32>} : memref<8x128xf32, #tpu.memory_space<vmem>>, vector<8x128xf32>,
    return
  }
  func.func @transform_0(%arg0: i32) -> (i32, i32) {
    %c0_i32 = arith.constant 0 : i32
    %c0_i32_0 = arith.constant 0 : i32
    return %arg0, %c0_i32 : i32, i32
  }
  func.func @transform_1(%arg0: i32) -> (i32, i32) {
    %c0_i32 = arith.constant 0 : i32
    %c0_i32_0 = arith.constant 0 : i32
    %c0_i32_1 = arith.constant 0 : i32
    return %c0_i32, %c0_i32_0 : i32, i32
  }
  func.func @transform_2(%arg0: i32) -> (i32, i32) {
    %c0_i32 = arith.constant 0 : i32
    %c0_i32_0 = arith.constant 0 : i32
    return %arg0, %c0_i32 : i32, i32
  }
}

</mosaic_0001>

<bundles_post_ra>
// kernel: dqn_task1_forward.1
= control target key start
LH: loop header
LB: loop body
LE: loop exit
PB: predicated region body
PF: predicated region fallthrough
CT: control target
= control target key end

     0   :  { %7 = vsyncpa [#allocation3], 0  ;;  %s563_s9 = smov [#allocation2]   ;;  %s632_s0 = inlined_call_operand.vmem [shape: f32[8,128], index: 0, kind: input, shape index: {}]   ;;  %s633_s1 = inlined_call_operand.hbm [shape: f32[392,128], index: 1, kind: input, shape index: {}]   ;;  %s634_s2 = inlined_call_operand.vmem [shape: f32[8,128], index: 2, kind: output, shape index: {}]  }
   0x1   :  { %s15_s10 = sshll.u32 %s563_s9, 4  ;;  %s539_s13 = scalar_lea.hbm %s633_s1, 6272  ;;  %s16_s10 = int_to_ptr.vmem [resolvable:$true] %s15_s10 }
   0x2   :  { %p540_p0 = scmp.ne.s32.totalorder %s633_s1, %s539_s13  ;;  %p543_p1 = scmp.lt.u32.totalorder %s539_s13, %s633_s1 }
   0x4   :  { %p545_p2 = pnand %p543_p1, %p540_p0 }
   0x6   :  { %548 = shalt.err (!%p545_p2)
}
   0x7   :  { %s549_s18 = scalar_lea.vmem %s16_s10, 6272  ;;  %p554_p4 = scmp.lt.s32.totalorder %s16_s10, %s16_s10 }
   0x8   :  { %p550_p3 = scmp.ne.s32.totalorder %s16_s10, %s549_s18  ;;  %p555_p5 = scmp.lt.s32.totalorder %s549_s18, %s549_s18 }
   0xa   :  { %p556_p6 = por %p555_p5, %p554_p4 }
   0xc   :  { %p557_p7 = pnand %p556_p6, %p550_p3 }
   0xe   :  { %560 = shalt.err (!%p557_p7)
}
   0xf   :  { %s564_s19 = smov 128   ;;  %s565_s20 = smov 8  }
  0x10   :  { %21 = dma.hbm_to_vmem [thread:$0]  %s633_s1, 6272, %s16_s10, [#allocation3], %s564_s19, %s564_s19, %s565_s20  }
  0x11   :  { %561 = dma.done.wait [#allocation3], 6272  }
  0x12   :  { %562 = vsyncadd [#allocation3], 4294961024  ;;  %v566_v0 = vmov 0.0|0.0   ;;  %vm567_vm0 = vmmov 0   ;;  %v568_v1 = vmov 0.0   ;;  %v26_v2 = vld [vmem:[#allocation2] sm:$0xff] }
  0x13   :  { %461 = vmatprep.subr.bf16.mxu0 %v566_v0  ;;  %388 = vmatprep.mubr.msk.f32.mxu0 %vm567_vm0, %v568_v1  ;;  %v27_v3 = vld [vmem:[#allocation2 + $0x8] sm:$0xff]  ;;  %v28_v4 = vld [vmem:[#allocation2 + $0x10] sm:$0xff]  ;;  %v29_v6 = vld [vmem:[#allocation2 + $0x18] sm:$0xff] }
  0x14   :  { %485 = vmatprep.subr.bf16.mxu1 %v566_v0  ;;  %423 = vmatprep.mubr.msk.f32.mxu1 %vm567_vm0, %v568_v1  ;;  %v462_v5 = vpack.c.bf16 %v27_v3, %v26_v2  ;;  %v465_v7 = vpack.c.bf16 %v29_v6, %v28_v4  ;;  %v30_v8 = vld [vmem:[#allocation2 + $0x20] sm:$0xff]  ;;  %v31_v9 = vld [vmem:[#allocation2 + $0x28] sm:$0xff]  ;;  %v44_v12 = vld [vmem:[#allocation2 + $0x90] sm:$0xff] }
  0x15   :  { %v42_v10 = vld [vmem:[#allocation2 + $0x80] sm:$0xff]  ;;  %v43_v11 = vld [vmem:[#allocation2 + $0x88] sm:$0xff]  ;;  %v45_v13 = vld [vmem:[#allocation2 + $0x98] sm:$0xff]  ;;  %v468_v14 = vpack.c.bf16 %v31_v9, %v30_v8  ;;  %v75_v9 = vlaneseq }
  0x16   :  { %463 = vmatpush3.bf16.msra.mxu0 %v462_v5  ;;  %v486_v15 = vpack.c.bf16 %v43_v11, %v42_v10  ;;  %v32_v16 = vld [vmem:[#allocation2 + $0x30] sm:$0xff]  ;;  %v33_v17 = vld [vmem:[#allocation2 + $0x38] sm:$0xff]  ;;  %v489_v18 = vpack.c.bf16 %v45_v13, %v44_v12  ;;  %v46_v19 = vld [vmem:[#allocation2 + $0xa0] sm:$0xff] }
  0x17   :  { %464 = vmatprep.subr.bf16.mxu0 %v566_v0  ;;  %v47_v20 = vld [vmem:[#allocation2 + $0xa8] sm:$0xff]  ;;  %v471_v21 = vpack.c.bf16 %v33_v17, %v32_v16  ;;  %v34_v22 = vld [vmem:[#allocation2 + $0x40] sm:$0xff]  ;;  %v48_v25 = vld [vmem:[#allocation2 + $0xb0] sm:$0xff]  ;;  %v76_v10 = vshrl.u32 %v75_v9, 7 }
  0x18   :  { %487 = vmatpush3.bf16.msra.mxu1 %v486_v15  ;;  %v35_v23 = vld [vmem:[#allocation2 + $0x48] sm:$0xff]  ;;  %v492_v24 = vpack.c.bf16 %v47_v20, %v46_v19  ;;  %v49_v26 = vld [vmem:[#allocation2 + $0xb8] sm:$0xff]  ;;  %v36_v28 = vld [vmem:[#allocation2 + $0x50] sm:$0xff] }
  0x19   :  { %488 = vmatprep.subr.bf16.mxu1 %v566_v0  ;;  %v474_v27 = vpack.c.bf16 %v35_v23, %v34_v22  ;;  %v37_v29 = vld [vmem:[#allocation2 + $0x58] sm:$0xff]  ;;  %v495_v30 = vpack.c.bf16 %v49_v26, %v48_v25  ;;  %v50_v31 = vld [vmem:[#allocation2 + $0xc0] sm:$0xff]  ;;  %v51_v32 = vld [vmem:[#allocation2 + $0xc8] sm:$0xff]  ;;  %v77_v11 = vsub.s32 0, %v76_v10  ;;  %v227_v26 = vsub.s32 2, %v76_v10 }
  0x1a   :  { %466 = vmatpush3.bf16.msra.mxu0 %v465_v7  ;;  %v477_v33 = vpack.c.bf16 %v37_v29, %v36_v28  ;;  %v38_v34 = vld [vmem:[#allocation2 + $0x60] sm:$0xff]  ;;  %v39_v35 = vld [vmem:[#allocation2 + $0x68] sm:$0xff]  ;;  %v498_v36 = vpack.c.bf16 %v51_v32, %v50_v31  ;;  %v52_v37 = vld [vmem:[#allocation2 + $0xd0] sm:$0xff] }
  0x1b   :  { %467 = vmatprep.subr.bf16.mxu0 %v566_v0  ;;  %v53_v38 = vld [vmem:[#allocation2 + $0xd8] sm:$0xff]  ;;  %v480_v39 = vpack.c.bf16 %v39_v35, %v38_v34  ;;  %v40_v40 = vld [vmem:[#allocation2 + $0x70] sm:$0xff]  ;;  %v54_v43 = vld [vmem:[#allocation2 + $0xe0] sm:$0xff] }
  0x1c   :  { %490 = vmatpush3.bf16.msra.mxu1 %v489_v18  ;;  %v41_v41 = vld [vmem:[#allocation2 + $0x78] sm:$0xff]  ;;  %v501_v42 = vpack.c.bf16 %v53_v38, %v52_v37  ;;  %v55_v44 = vld [vmem:[#allocation2 + $0xe8] sm:$0xff]  ;;  %v25_v47 = vld [vmem:[%s632_s0] sm:$0xff] }
  0x1d   :  { %491 = vmatprep.subr.bf16.mxu1 %v566_v0  ;;  %v483_v45 = vpack.c.bf16 %v41_v41, %v40_v40  ;;  %v504_v46 = vpack.c.bf16 %v55_v44, %v54_v43  ;;  %v56_v48 = vld [vmem:[#allocation2 + $0xf0] sm:$0xff]  ;;  %v57_v49 = vld [vmem:[#allocation2 + $0xf8] sm:$0xff]  ;;  %v58_v51 = vld [vmem:[#allocation2 + $0x100] sm:$0xff] }
  0x1e   :  { %469 = vmatpush3.bf16.msra.mxu0 %v468_v14  ;;  %v507_v50 = vpack.c.bf16 %v57_v49, %v56_v48  ;;  %v59_v52 = vld [vmem:[#allocation2 + $0x108] sm:$0xff]  ;;  %v60_v53 = vld [vmem:[#allocation2 + $0x110] sm:$0xff]  ;;  %v61_v55 = vld [vmem:[#allocation2 + $0x118] sm:$0xff] }
  0x1f   :  { %470 = vmatprep.subr.bf16.mxu0 %v566_v0  ;;  %v510_v54 = vpack.c.bf16 %v59_v52, %v58_v51  ;;  %v513_v56 = vpack.c.bf16 %v61_v55, %v60_v53  ;;  %v62_v57 = vld [vmem:[#allocation2 + $0x120] sm:$0xff]  ;;  %v63_v58 = vld [vmem:[#allocation2 + $0x128] sm:$0xff]  ;;  %v64_v60 = vld [vmem:[#allocation2 + $0x130] sm:$0xff] }
  0x20   :  { %493 = vmatpush3.bf16.msra.mxu1 %v492_v24  ;;  %v516_v59 = vpack.c.bf16 %v63_v58, %v62_v57  ;;  %v65_v61 = vld [vmem:[#allocation2 + $0x138] sm:$0xff]  ;;  %v66_v63 = vld [vmem:[#allocation2 + $0x140] sm:$0xff]  ;;  %v68_v3 = vld [vmem:[#allocation2 + $0x150] sm:$0xff] }
  0x21   :  { %494 = vmatprep.subr.bf16.mxu1 %v566_v0  ;;  %v519_v62 = vpack.c.bf16 %v65_v61, %v64_v60  ;;  %v69_v4 = vld [vmem:[#allocation2 + $0x158] sm:$0xff]  ;;  %v70_v6 = vld [vmem:[#allocation2 + $0x160] sm:$0xff]  ;;  %v71_v7 = vld [vmem:[#allocation2 + $0x168] sm:$0xff] }
  0x22   :  { %472 = vmatpush3.bf16.msra.mxu0 %v471_v21  ;;  %v525_v5 = vpack.c.bf16 %v69_v4, %v68_v3  ;;  %v528_v8 = vpack.c.bf16 %v71_v7, %v70_v6  ;;  %v74_v12 = vld [vmem:[#allocation2 + $0x180] sm:$0xff]  ;;  %v72_v18 = vld [vmem:[#allocation2 + $0x170] sm:$0xff]  ;;  %v73_v19 = vld [vmem:[#allocation2 + $0x178] sm:$0xff]  ;;  %v152_v21 = vsub.s32 1, %v76_v10 }
  0x23   :  { %473 = vmatprep.subr.bf16.mxu0 %v566_v0  ;;  %v78_v13 = vrot.slane %v74_v12, %v77_v11  ;;  %v531_v20 = vpack.c.bf16 %v73_v19, %v72_v18 }
  0x24   :  { %496 = vmatpush3.bf16.msra.mxu1 %v495_v30  ;;  %v153_v22 = vrot.slane %v74_v12, %v152_v21 }
  0x25   :  { %497 = vmatprep.subr.bf16.mxu1 %v566_v0 }
  0x26   :  { %475 = vmatpush3.bf16.msra.mxu0 %v474_v27  ;;  %v228_v27 = vrot.slane %v74_v12, %v227_v26 }
  0x27   :  { %476 = vmatprep.subr.bf16.mxu0 %v566_v0 }
  0x28   :  { %499 = vmatpush3.bf16.msra.mxu1 %v498_v36 }
  0x29   :  { %500 = vmatprep.subr.bf16.mxu1 %v566_v0 }
  0x2a   :  { %478 = vmatpush3.bf16.msra.mxu0 %v477_v33 }
  0x2b   :  { %479 = vmatprep.subr.bf16.mxu0 %v566_v0 }
  0x2c   :  { %502 = vmatpush3.bf16.msra.mxu1 %v501_v42 }
  0x2d   :  { %503 = vmatprep.subr.bf16.mxu1 %v566_v0 }
  0x2e   :  { %481 = vmatpush3.bf16.msra.mxu0 %v480_v39 }
  0x2f   :  { %482 = vmatprep.subr.bf16.mxu0 %v566_v0 }
  0x30   :  { %505 = vmatpush3.bf16.msra.mxu1 %v504_v46 }
  0x31   :  { %506 = vmatprep.subr.bf16.mxu1 %v566_v0 }
  0x32   :  { %484 = vmatpush3.bf16.msra.mxu0 %v483_v45 }
  0x33   :  { %509 = vmatprep.subr.bf16.mxu0 %v566_v0 }
  0x34   :  { %508 = vmatpush3.bf16.msra.mxu1 %v507_v50 }
  0x35   :  { %389 = vmatmul.mubr.f32.vlgmr.msra.gmra.mrb[0].mxu0 %v25_v47 }
  0x36   :  { %458 = vmatprep.mubr.msk.f32.mxu0 %vm567_vm0, %v568_v1  ;;  %511 = vmatpush3.bf16.msra.mxu0 %v510_v54  ;;  %v67_v1 = vld [vmem:[#allocation2 + $0x148] sm:$0xff] }
  0x37   :  { %512 = vmatprep.subr.bf16.mxu0 %v566_v0  ;;  %v522_v2 = vpack.c.bf16 %v67_v1, %v66_v63 }
  0x3a   :  { %514 = vmatpush3.bf16.msra.mxu0 %v513_v56 }
  0x3b   :  { %515 = vmatprep.subr.bf16.mxu0 %v566_v0 }
  0x3e   :  { %517 = vmatpush3.bf16.msra.mxu0 %v516_v59 }
  0x3f   :  { %518 = vmatprep.subr.bf16.mxu0 %v566_v0 }
  0x42   :  { %520 = vmatpush3.bf16.msra.mxu0 %v519_v62 }
  0x43   :  { %521 = vmatprep.subr.bf16.mxu0 %v566_v0 }
  0x46   :  { %523 = vmatpush3.bf16.msra.mxu0 %v522_v2 }
  0x47   :  { %524 = vmatprep.subr.bf16.mxu0 %v566_v0 }
  0x4a   :  { %526 = vmatpush3.bf16.msra.mxu0 %v525_v5 }
  0x4b   :  { %527 = vmatprep.subr.bf16.mxu0 %v566_v0 }
  0x4e   :  { %529 = vmatpush3.bf16.msra.mxu0 %v528_v8 }
  0x4f   :  { %530 = vmatprep.subr.bf16.mxu0 %v566_v0 }
  0x52   :  { %532 = vmatpush3.bf16.msra.mxu0 %v531_v20 }
 0x108   :  { %v145_v14 = vpop.f32.mrb[0].mxu0 }
 0x109   :  { %v146_v15 = vadd.f32 %v145_v14, %v78_v13  ;;  %v390_v16 = vpop.f32.mrb[1].mxu0 }
 0x10b   :  { %v149_v17 = vmax.f32 %v146_v15, 0.0 }
 0x10d   :  { %424 = vmatmul.mubr.f32.vlgmr.msra.gmra.mrb[0].mxu1 %v149_v17 }
 0x1e0   :  { %v220_v23 = vpop.f32.mrb[0].mxu1 }
 0x1e1   :  { %v221_v24 = vadd.f32 %v220_v23, %v153_v22  ;;  %v425_v25 = vpop.f32.mrb[1].mxu1 }
 0x1e3   :  { %v224_v0 = vmax.f32 %v221_v24, 0.0 }
 0x1e5   :  { %459 = vmatmul.mubr.f32.vlgmr.msra.gmra.mrb[2].mxu0 %v224_v0 }
 0x2b8   :  { %v295_v28 = vpop.f32.mrb[2].mxu0 }
 0x2b9   :  { %v296_v29 = vadd.f32 %v295_v28, %v228_v27  ;;  %v460_v30 = vpop.f32.mrb[3].mxu0 }
 0x2bb   :  { %299 = vst [vmem:[%s634_s2] sm:$0xff] %v296_v29 }
 0x2bc   :  { %304 = vsyncpa [#allocation3], 1 }

</bundles_post_ra>
